<compile_context>
chip_gen: v6e
topology: v6e:2x2x1
jax: 0.10.0
libtpu: 0.0.40
codegen_flags: <defaults>
</compile_context>

<pallas_src>
import functools

import jax
import jax.numpy as jnp
from jax import lax
from jax.experimental import pallas as pl
from jax.experimental.pallas import tpu as pltpu

ALPHA = 0.5  # ScaleAndShiftInvariantLoss default


def _round_up(x, m):
    return ((x + m - 1) // m) * m


def _ssi_loss_kernel(pred_ref, tgt_ref, mask_ref, out_ref, *, H, W):
    # Refs are (Hp, Wp) f32; padded rows/cols (if any) carry mask == 0.
    p = pred_ref[...]
    t = tgt_ref[...] * 50.0 + 0.5          # target = target * 50 + 0.5
    m = mask_ref[...]

    # ---- compute_scale_and_shift (closed-form 2x2 solve), hoisted products --
    mp = m * p
    a00 = jnp.sum(mp * p)
    a01 = jnp.sum(mp)
    a11 = jnp.sum(m)
    b0 = jnp.sum(mp * t)
    b1 = jnp.sum(m * t)

    det = a00 * a11 - a01 * a01
    valid = det != 0.0
    safe_det = jnp.where(valid, det, 1.0)
    scale = jnp.where(valid, (a11 * b0 - a01 * b1) / safe_det, 0.0)
    shift = jnp.where(valid, (-a01 * b0 + a00 * b1) / safe_det, 0.0)

    # ---- masked MSE data term (per-image sum) -------------------------------
    res = scale * p + shift - t            # prediction_ssi - target
    diff = m * res                         # zero in any padded region
    mse_img = jnp.sum(diff * res)          # == sum(mask * res * res)

    # ---- gradient regularization (single scale) via lane/sublane rolls ------
    hp, wp = p.shape
    d_nx = pltpu.roll(diff, shift=wp - 1, axis=1)   # diff[:, j+1] at column j
    m_nx = pltpu.roll(m,    shift=wp - 1, axis=1)
    d_ny = pltpu.roll(diff, shift=hp - 1, axis=0)   # diff[i+1, :] at row i
    m_ny = pltpu.roll(m,    shift=hp - 1, axis=0)

    # Iota masks kill the wrap-around pair (and any padded pairs); this avoids
    # needing an extra zero row/column of padding.
    col = lax.broadcasted_iota(jnp.int32, (hp, wp), 1)
    row = lax.broadcasted_iota(jnp.int32, (hp, wp), 0)
    gx = jnp.where(col < W - 1, jnp.abs(d_nx - diff) * (m_nx * m), 0.0)
    gy = jnp.where(row < H - 1, jnp.abs(d_ny - diff) * (m_ny * m), 0.0)
    grad_img = jnp.sum(gx + gy)

    # ---- emit lane-dense per-image partials: [mse, grad, sum(mask), 0, ...] -
    lane = lax.broadcasted_iota(jnp.int32, (1, 1, 128), 2)
    out_ref[...] = jnp.where(
        lane == 0, mse_img,
        jnp.where(lane == 1, grad_img,
                  jnp.where(lane == 2, a11, 0.0)))


def scale_and_shift_invariant_loss(prediction, target, mask=None):
    """Forward pass of ScaleAndShiftInvariantLoss. Inputs: (B, H, W)."""
    prediction = jnp.asarray(prediction, jnp.float32)
    target = jnp.asarray(target, jnp.float32)
    if mask is None:
        mask = jnp.ones(target.shape, jnp.float32)
    mask = jnp.asarray(mask, jnp.float32)
    B, H, W = prediction.shape

    # Pad to lane/sublane-aligned tiles (no-op when already aligned).  Padded
    # pixels carry mask == 0, and the in-kernel iota masks handle boundaries.
    Hp = _round_up(H, 8)
    Wp = _round_up(W, 128)
    if Hp != H or Wp != W:
        pad = ((0, 0), (0, Hp - H), (0, Wp - W))
        pred_p = jnp.pad(prediction, pad)
        tgt_p = jnp.pad(target, pad)
        mask_p = jnp.pad(mask, pad)
    else:
        pred_p, tgt_p, mask_p = prediction, target, mask

    # VMEM budget: 3 double-buffered f32 input tiles + elementwise temporaries.
    # TODO(synk): images whose per-image tile exceeds ~64 MiB VMEM (v7x) would
    # need a two-phase H-tiled grid (Gram sums first, then MSE+gradient).
    per_image = Hp * Wp * 4
    needed = int(1.25 * (3 * 2 + 12) * per_image)
    vmem_limit = min(max(needed, 32 * 1024 * 1024), 64 * 1024 * 1024)

    kernel = functools.partial(_ssi_loss_kernel, H=H, W=W)

    parts = pl.pallas_call(
        kernel,
        out_shape=jax.ShapeDtypeStruct((B, 1, 128), jnp.float32),
        grid_spec=pltpu.PrefetchScalarGridSpec(
            num_scalar_prefetch=0,
            grid=(B,),
            in_specs=[
                pl.BlockSpec((None, Hp, Wp), lambda b: (b, 0, 0)),
                pl.BlockSpec((None, Hp, Wp), lambda b: (b, 0, 0)),
                pl.BlockSpec((None, Hp, Wp), lambda b: (b, 0, 0)),
            ],
            out_specs=pl.BlockSpec((1, 1, 128), lambda b: (b, 0, 0)),
        ),
        compiler_params=pltpu.CompilerParams(
            dimension_semantics=("parallel",),
            vmem_limit_bytes=vmem_limit,
        ),
    )(pred_p, tgt_p, mask_p)

    mse_sum = jnp.sum(parts[:, 0, 0])
    grad_sum = jnp.sum(parts[:, 0, 1])
    m_sum = jnp.sum(parts[:, 0, 2])
    data_loss = jnp.where(2.0 * m_sum != 0.0, mse_sum / (2.0 * m_sum), 0.0)
    grad_loss = jnp.where(m_sum != 0.0, grad_sum / m_sum, 0.0)
    return data_loss + ALPHA * grad_loss


def _reference(prediction, target, mask):
    """Pure-JAX reimplementation of the PyTorch module for verification."""
    target = target * 50.0 + 0.5
    a00 = jnp.sum(mask * prediction * prediction, (1, 2))
    a01 = jnp.sum(mask * prediction, (1, 2))
    a11 = jnp.sum(mask, (1, 2))
    b0 = jnp.sum(mask * prediction * target, (1, 2))
    b1 = jnp.sum(mask * target, (1, 2))
    det = a00 * a11 - a01 * a01
    sd = jnp.where(det != 0, det, 1.0)
    x0 = jnp.where(det != 0, (a11 * b0 - a01 * b1) / sd, 0.0)
    x1 = jnp.where(det != 0, (-a01 * b0 + a00 * b1) / sd, 0.0)
    pssi = x0[:, None, None] * prediction + x1[:, None, None]

    res = pssi - target
    mse_img = jnp.sum(mask * res * res, (1, 2))
    M = jnp.sum(mask, (1, 2))
    data = jnp.where(jnp.sum(2 * M) != 0, jnp.sum(mse_img) / jnp.sum(2 * M), 0.0)

    diff = mask * res
    gx = jnp.abs(diff[:, :, 1:] - diff[:, :, :-1]) * (mask[:, :, 1:] * mask[:, :, :-1])
    gy = jnp.abs(diff[:, 1:, :] - diff[:, :-1, :]) * (mask[:, 1:, :] * mask[:, :-1, :])
    img_loss = jnp.sum(gx, (1, 2)) + jnp.sum(gy, (1, 2))
    grad = jnp.where(jnp.sum(M) != 0, jnp.sum(img_loss) / jnp.sum(M), 0.0)
    return data + ALPHA * grad


if __name__ == "__main__":
    B, H, W = 2, 16, 16
    key = jax.random.PRNGKey(0)
    kp, kt, km = jax.random.split(key, 3)
    prediction = jax.random.normal(kp, (B, H, W), dtype=jnp.float32)
    target = jax.random.uniform(kt, (B, H, W), dtype=jnp.float32)
    # binary float mask (some invalid pixels), like a real validity mask
    mask = (jax.random.uniform(km, (B, H, W)) > 0.2).astype(jnp.float32)

    loss = scale_and_shift_invariant_loss(prediction, target, mask)
    loss = jax.block_until_ready(loss)

    ref = _reference(prediction, target, mask)
    assert jnp.allclose(loss, ref, rtol=1e-4, atol=1e-5), (loss, ref)

    print("KERNEL_OK")
</pallas_src>

<mosaic_0001>
module attributes {stable_mosaic.version = 11 : i64} {
  func.func @_ssi_loss_kernel(%arg0: i32, %arg1: memref<1x16x128xf32, #tpu.memory_space<vmem>>, %arg2: memref<1x16x128xf32, #tpu.memory_space<vmem>>, %arg3: memref<1x16x128xf32, #tpu.memory_space<vmem>>, %arg4: memref<1x1x128xf32, #tpu.memory_space<vmem>>) attributes {dimension_semantics = [#tpu.dimension_semantics<parallel>], iteration_bounds = array<i64: 2>, scalar_prefetch = 0 : i64, scratch_operands = 0 : i64, tpu.core_type = #tpu.core_type<tc>, window_params = [{transform_indices = @transform_0, window_bounds = array<i64: 1, 16, 128>}, {transform_indices = @transform_1, window_bounds = array<i64: 1, 16, 128>}, {transform_indices = @transform_2, window_bounds = array<i64: 1, 16, 128>}, {transform_indices = @transform_3, window_bounds = array<i64: 1, 1, 128>}]} {
    %c0 = arith.constant 0 : index
    %c0_0 = arith.constant 0 : index
    %c0_1 = arith.constant 0 : index
    %0 = vector.load %arg1[%c0, %c0_0, %c0_1] : memref<1x16x128xf32, #tpu.memory_space<vmem>>, vector<1x16x128xf32>
    %1 = vector.shape_cast %0 : vector<1x16x128xf32> to vector<16x128xf32>
    %c0_2 = arith.constant 0 : index
    %c0_3 = arith.constant 0 : index
    %c0_4 = arith.constant 0 : index
    %2 = vector.load %arg2[%c0_2, %c0_3, %c0_4] : memref<1x16x128xf32, #tpu.memory_space<vmem>>, vector<1x16x128xf32>
    %3 = vector.shape_cast %2 : vector<1x16x128xf32> to vector<16x128xf32>
    %cst = arith.constant 5.000000e+01 : f32
    %4 = vector.broadcast %cst : f32 to vector<16x128xf32>
    %5 = arith.mulf %3, %4 : vector<16x128xf32>
    %cst_5 = arith.constant 5.000000e-01 : f32
    %6 = vector.broadcast %cst_5 : f32 to vector<16x128xf32>
    %7 = arith.addf %5, %6 : vector<16x128xf32>
    %c0_6 = arith.constant 0 : index
    %c0_7 = arith.constant 0 : index
    %c0_8 = arith.constant 0 : index
    %8 = vector.load %arg3[%c0_6, %c0_7, %c0_8] : memref<1x16x128xf32, #tpu.memory_space<vmem>>, vector<1x16x128xf32>
    %9 = vector.shape_cast %8 : vector<1x16x128xf32> to vector<16x128xf32>
    %10 = arith.mulf %9, %1 : vector<16x128xf32>
    %11 = arith.mulf %10, %1 : vector<16x128xf32>
    %12 = vector.shape_cast %11 : vector<16x128xf32> to vector<1x16x128xf32>
    %cst_9 = arith.constant dense<0.000000e+00> : vector<1xf32>
    %13 = vector.multi_reduction <add>, %12, %cst_9 [1, 2] : vector<1x16x128xf32> to vector<1xf32>
    %14 = vector.shape_cast %13 : vector<1xf32> to vector<1x1x1xf32>
    %15 = vector.extract %14[0, 0, 0] : f32 from vector<1x1x1xf32>
    %16 = vector.shape_cast %10 : vector<16x128xf32> to vector<1x16x128xf32>
    %cst_10 = arith.constant dense<0.000000e+00> : vector<1xf32>
    %17 = vector.multi_reduction <add>, %16, %cst_10 [1, 2] : vector<1x16x128xf32> to vector<1xf32>
    %18 = vector.shape_cast %17 : vector<1xf32> to vector<1x1x1xf32>
    %19 = vector.extract %18[0, 0, 0] : f32 from vector<1x1x1xf32>
    %20 = vector.shape_cast %9 : vector<16x128xf32> to vector<1x16x128xf32>
    %cst_11 = arith.constant dense<0.000000e+00> : vector<1xf32>
    %21 = vector.multi_reduction <add>, %20, %cst_11 [1, 2] : vector<1x16x128xf32> to vector<1xf32>
    %22 = vector.shape_cast %21 : vector<1xf32> to vector<1x1x1xf32>
    %23 = vector.extract %22[0, 0, 0] : f32 from vector<1x1x1xf32>
    %24 = arith.mulf %10, %7 : vector<16x128xf32>
    %25 = vector.shape_cast %24 : vector<16x128xf32> to vector<1x16x128xf32>
    %cst_12 = arith.constant dense<0.000000e+00> : vector<1xf32>
    %26 = vector.multi_reduction <add>, %25, %cst_12 [1, 2] : vector<1x16x128xf32> to vector<1xf32>
    %27 = vector.shape_cast %26 : vector<1xf32> to vector<1x1x1xf32>
    %28 = vector.extract %27[0, 0, 0] : f32 from vector<1x1x1xf32>
    %29 = arith.mulf %9, %7 : vector<16x128xf32>
    %30 = vector.shape_cast %29 : vector<16x128xf32> to vector<1x16x128xf32>
    %cst_13 = arith.constant dense<0.000000e+00> : vector<1xf32>
    %31 = vector.multi_reduction <add>, %30, %cst_13 [1, 2] : vector<1x16x128xf32> to vector<1xf32>
    %32 = vector.shape_cast %31 : vector<1xf32> to vector<1x1x1xf32>
    %33 = vector.extract %32[0, 0, 0] : f32 from vector<1x1x1xf32>
    %34 = arith.mulf %15, %23 : f32
    %35 = arith.mulf %19, %19 : f32
    %36 = arith.subf %34, %35 : f32
    %cst_14 = arith.constant 0.000000e+00 : f32
    %37 = arith.cmpf one, %36, %cst_14 : f32
    %cst_15 = arith.constant 1.000000e+00 : f32
    %38 = arith.select %37, %36, %cst_15 : f32
    %39 = arith.mulf %23, %28 : f32
    %40 = arith.mulf %19, %33 : f32
    %41 = arith.subf %39, %40 : f32
    %42 = arith.divf %41, %38 : f32
    %cst_16 = arith.constant 0.000000e+00 : f32
    %43 = arith.select %37, %42, %cst_16 : f32
    %cst_17 = arith.constant 0.000000e+00 : f32
    %44 = arith.subf %cst_17, %19 : f32
    %45 = arith.mulf %44, %28 : f32
    %46 = arith.mulf %15, %33 : f32
    %47 = arith.addf %45, %46 : f32
    %48 = arith.divf %47, %38 : f32
    %cst_18 = arith.constant 0.000000e+00 : f32
    %49 = arith.select %37, %48, %cst_18 : f32
    %50 = vector.broadcast %43 : f32 to vector<16x128xf32>
    %51 = arith.mulf %50, %1 : vector<16x128xf32>
    %52 = vector.broadcast %49 : f32 to vector<16x128xf32>
    %53 = arith.addf %51, %52 : vector<16x128xf32>
    %54 = arith.subf %53, %7 : vector<16x128xf32>
    %55 = arith.mulf %9, %54 : vector<16x128xf32>
    %56 = arith.mulf %55, %54 : vector<16x128xf32>
    %57 = vector.shape_cast %56 : vector<16x128xf32> to vector<1x16x128xf32>
    %cst_19 = arith.constant dense<0.000000e+00> : vector<1xf32>
    %58 = vector.multi_reduction <add>, %57, %cst_19 [1, 2] : vector<1x16x128xf32> to vector<1xf32>
    %59 = vector.shape_cast %58 : vector<1xf32> to vector<1x1x1xf32>
    %60 = vector.extract %59[0, 0, 0] : f32 from vector<1x1x1xf32>
    %c127_i32 = arith.constant 127 : i32
    %61 = tpu.dynamic_rotate %55 by %c127_i32 dim 1 : vector<16x128xf32>, i32 -> vector<16x128xf32>
    %c127_i32_20 = arith.constant 127 : i32
    %62 = tpu.dynamic_rotate %9 by %c127_i32_20 dim 1 : vector<16x128xf32>, i32 -> vector<16x128xf32>
    %c15_i32 = arith.constant 15 : i32
    %63 = tpu.dynamic_rotate %55 by %c15_i32 dim 0 : vector<16x128xf32>, i32 -> vector<16x128xf32>
    %c15_i32_21 = arith.constant 15 : i32
    %64 = tpu.dynamic_rotate %9 by %c15_i32_21 dim 0 : vector<16x128xf32>, i32 -> vector<16x128xf32>
    %65 = tpu.iota {dimensions = array<i32: 1>} : vector<16x128xi32>
    %66 = tpu.iota {dimensions = array<i32: 0>} : vector<16x128xi32>
    %c15_i32_22 = arith.constant 15 : i32
    %67 = vector.broadcast %c15_i32_22 : i32 to vector<16x128xi32>
    %68 = arith.cmpi slt, %65, %67 : vector<16x128xi32>
    %69 = arith.subf %61, %55 : vector<16x128xf32>
    %70 = math.absf %69 : vector<16x128xf32>
    %71 = arith.mulf %62, %9 : vector<16x128xf32>
    %72 = arith.mulf %70, %71 : vector<16x128xf32>
    %cst_23 = arith.constant 0.000000e+00 : f32
    %73 = vector.broadcast %cst_23 : f32 to vector<16x128xf32>
    %74 = arith.select %68, %72, %73 : vector<16x128xi1>, vector<16x128xf32>
    %c15_i32_24 = arith.constant 15 : i32
    %75 = vector.broadcast %c15_i32_24 : i32 to vector<16x128xi32>
    %76 = arith.cmpi slt, %66, %75 : vector<16x128xi32>
    %77 = arith.subf %63, %55 : vector<16x128xf32>
    %78 = math.absf %77 : vector<16x128xf32>
    %79 = arith.mulf %64, %9 : vector<16x128xf32>
    %80 = arith.mulf %78, %79 : vector<16x128xf32>
    %cst_25 = arith.constant 0.000000e+00 : f32
    %81 = vector.broadcast %cst_25 : f32 to vector<16x128xf32>
    %82 = arith.select %76, %80, %81 : vector<16x128xi1>, vector<16x128xf32>
    %83 = arith.addf %74, %82 : vector<16x128xf32>
    %84 = vector.shape_cast %83 : vector<16x128xf32> to vector<1x16x128xf32>
    %cst_26 = arith.constant dense<0.000000e+00> : vector<1xf32>
    %85 = vector.multi_reduction <add>, %84, %cst_26 [1, 2] : vector<1x16x128xf32> to vector<1xf32>
    %86 = vector.shape_cast %85 : vector<1xf32> to vector<1x1x1xf32>
    %87 = vector.extract %86[0, 0, 0] : f32 from vector<1x1x1xf32>
    %88 = tpu.iota {dimensions = array<i32: 2>} : vector<1x1x128xi32>
    %c0_i32 = arith.constant 0 : i32
    %89 = vector.broadcast %c0_i32 : i32 to vector<1x1x128xi32>
    %90 = arith.cmpi eq, %88, %89 : vector<1x1x128xi32>
    %c1_i32 = arith.constant 1 : i32
    %91 = vector.broadcast %c1_i32 : i32 to vector<1x1x128xi32>
    %92 = arith.cmpi eq, %88, %91 : vector<1x1x128xi32>
    %c2_i32 = arith.constant 2 : i32
    %93 = vector.broadcast %c2_i32 : i32 to vector<1x1x128xi32>
    %94 = arith.cmpi eq, %88, %93 : vector<1x1x128xi32>
    %cst_27 = arith.constant 0.000000e+00 : f32
    %95 = vector.broadcast %23 : f32 to vector<1x1x128xf32>
    %96 = vector.broadcast %cst_27 : f32 to vector<1x1x128xf32>
    %97 = arith.select %94, %95, %96 : vector<1x1x128xi1>, vector<1x1x128xf32>
    %98 = vector.broadcast %87 : f32 to vector<1x1x128xf32>
    %99 = arith.select %92, %98, %97 : vector<1x1x128xi1>, vector<1x1x128xf32>
    %100 = vector.broadcast %60 : f32 to vector<1x1x128xf32>
    %101 = arith.select %90, %100, %99 : vector<1x1x128xi1>, vector<1x1x128xf32>
    %c0_28 = arith.constant 0 : index
    %c0_29 = arith.constant 0 : index
    %c0_30 = arith.constant 0 : index
    %102 = vector.load %arg4[%c0_28, %c0_29, %c0_30] : memref<1x1x128xf32, #tpu.memory_space<vmem>>, vector<1x1x128xf32>
    tpu.vector_store %arg4[%c0_28, %c0_29, %c0_30], %101 {strides = array<i32>} : memref<1x1x128xf32, #tpu.memory_space<vmem>>, vector<1x1x128xf32>,
    return
  }
  func.func @transform_0(%arg0: i32) -> (i32, i32, i32) {
    %c0_i32 = arith.constant 0 : i32
    %c0_i32_0 = arith.constant 0 : i32
    %c0_i32_1 = arith.constant 0 : i32
    return %arg0, %c0_i32, %c0_i32_0 : i32, i32, i32
  }
  func.func @transform_1(%arg0: i32) -> (i32, i32, i32) {
    %c0_i32 = arith.constant 0 : i32
    %c0_i32_0 = arith.constant 0 : i32
    %c0_i32_1 = arith.constant 0 : i32
    return %arg0, %c0_i32, %c0_i32_0 : i32, i32, i32
  }
  func.func @transform_2(%arg0: i32) -> (i32, i32, i32) {
    %c0_i32 = arith.constant 0 : i32
    %c0_i32_0 = arith.constant 0 : i32
    %c0_i32_1 = arith.constant 0 : i32
    return %arg0, %c0_i32, %c0_i32_0 : i32, i32, i32
  }
  func.func @transform_3(%arg0: i32) -> (i32, i32, i32) {
    %c0_i32 = arith.constant 0 : i32
    %c0_i32_0 = arith.constant 0 : i32
    %c0_i32_1 = arith.constant 0 : i32
    return %arg0, %c0_i32, %c0_i32_0 : i32, i32, i32
  }
}

</mosaic_0001>

<bundles_post_ra>
// kernel: tpu_custom_call.1
= control target key start
LH: loop header
LB: loop body
LE: loop exit
PB: predicated region body
PF: predicated region fallthrough
CT: control target
= control target key end

     0   :  { %s1129_s0 = inlined_call_operand.hbm [shape: f32[2,16,128], index: 0, kind: input, shape index: {}]   ;;  %s1130_s1 = inlined_call_operand.hbm [shape: f32[2,16,128], index: 1, kind: input, shape index: {}]   ;;  %s1131_s2 = inlined_call_operand.hbm [shape: f32[2,16,128], index: 2, kind: input, shape index: {}]   ;;  %s1132_s3 = inlined_call_operand.hbm [shape: f32[2,1,128], index: 3, kind: output, shape index: {}]  }
   0x1   :  { %1139 = sst [smem:[#allocation12_spill]] %s1129_s0 }
   0x2   :  { %1140 = sst [smem:[#allocation13_spill]] %s1130_s1 }
   0x3   :  { %8 = vsyncpa [#allocation3], 0 }
   0x4   :  { %10 = vsyncpa [#allocation3 + $0x1], 0 }
   0x5   :  { %11 = vsyncpa [#allocation6], 0 }
   0x6   :  { %13 = vsyncpa [#allocation6 + $0x1], 0 }
   0x7   :  { %14 = vsyncpa [#allocation4], 0 }
   0x8   :  { %16 = vsyncpa [#allocation4 + $0x1], 0  ;;  %s846_s12 = smov 0   ;;  %s848_s13 = smov 0  }
   0x9   :  { %s850_s14 = smov 0   ;;  %s852_s15 = smov 0  }
   0xa LB: > { %s867_s16 = sadd.s32 4294967295, %s817_s15   ;;  %s566_s17 = sadd.s32 4294967294, %s817_s15   ;;  %s817_s15 = sphi %s852_s15, %s1160_s15   ;;  %s813_s14 = sphi %s850_s14, %s1159_s14   ;;  %s809_s13 = sphi %s848_s13, %s1158_s13   ;;  %s805_s12 = sphi %s846_s12, %s1157_s12  }
   0xb   : > { %s871_s18 = sadd.s32 1, %s817_s15   ;;  %s29_s19 = sadd.s32 1, %s813_s14 }
   0xc   : > { %s26_s20 = ssub.s32 %s817_s15, %s871_s18  ;;  %p36_p0 = scmp.ne.s32.totalorder %s813_s14, %s809_s13 }
   0xd   : > { %p27_p1 = scmp.eq.s32.totalorder %s26_s20, 0  ;;  %p37_p2 = scmp.eq.s32.totalorder %s817_s15, 0 }
   0xe   : > { %p42_p3 = scmp.ne.s32.totalorder %s809_s13, %s805_s12  ;;  %p43_p4 = scmp.eq.s32.totalorder %s867_s16, 0 }
   0xf   : > { %s883_s21 = scalar_select %p27_p1, %s813_s14, %s29_s19  }
  0x10   : > { %p38_p5 = por %p37_p2, %p36_p0  ;;  %p885_p6 = por %p43_p4, %p42_p3 }
  0x11   : > { %p118_p7 = scmp.eq.s32.totalorder %s867_s16, 1  ;;  %p124_p8 = scmp.eq.s32.totalorder %s566_s17, 1 }
  0x12   : > { %s1141_s22 = scalar_select %p885_p6, 1, 0 }
  0x13   : > { %p626_p10 = scmp.lt.s32.totalorder %s817_s15, 2  ;;  %p892_p11 = por %p118_p7, %p36_p0 }
  0x14   : > { %p896_p12 = por %p124_p8, %p42_p3  ;;  %s144_s25 = sand.u32 1, %s813_s14  }
  0x15   : > { %s1142_s23 = scalar_select %p892_p11, 1, 0 }
  0x16   : > { %s1143_s24 = scalar_select %p896_p12, 1, 0 }
  0x17   : > { %s902_s26 = sshll.u32 %s817_s15, 8  ;;  %s906_s27 = sshll.u32 %s144_s25, 4 }
  0x18   : > { %p908_p13 = pnand %p626_p10, %p38_p5  ;;  %s165_s29 = sand.u32 1, %s817_s15  }
  0x19   : > { %s1145_s1 = sld [smem:[#allocation13_spill]]  ;;  %s169_s6 = scalar_lea.vmem [#allocation5], %s906_s27 }
  0x1a   : > { %s176_s7 = sshll.u32 %s169_s6, 4  ;;  %s923_s8 = scalar_lea.sflag [#allocation6], %s165_s29  ;;  %s920_s7 = int_to_ptr.vmem [resolvable:$true] %s176_s7 }
  0x1b   : > { %p929_p2 = pneg %p908_p13 }
  0x1f   : > { %s917_s5 = scalar_lea.hbm %s1145_s1, %s902_s26  ;;  %s670_s19 = scalar_lea.hbm %s1145_s1, 512 }
  0x20   : > { %s665_s9 = scalar_lea.hbm %s917_s5, 256  ;;  %p671_p5 = scmp.lt.s32.totalorder %s917_s5, %s1145_s1 }
  0x21   : > { %p666_p1 = scmp.ne.s32.totalorder %s917_s5, %s665_s9  ;;  %p672_p7 = scmp.lt.s32.totalorder %s670_s19, %s665_s9 }
  0x23   : > { %p668_p3 = pnand %p929_p2, %p666_p1  ;;  %p673_p8 = por %p672_p7, %p671_p5 }
  0x25   : > { %p669_p4 = pneg %p668_p3 }
  0x27   : > { %p674_p10 = pnand %p673_p8, %p669_p4 }
  0x29   : > { %677 = shalt.err (!%p674_p10)
}
  0x2a   : > { %s678_s29 = scalar_lea.vmem %s920_s7, 256  ;;  %s819_s4 = smov [#allocation5]  }
  0x2b   : > { %p679_p9 = scmp.ne.s32.totalorder %s920_s7, %s678_s29  ;;  %s683_s6 = sshll.u32 %s819_s4, 4  ;;  %s684_s6 = int_to_ptr.vmem [resolvable:$false] %s683_s6 }
  0x2c   : > { %s685_s11 = scalar_lea.vmem %s684_s6, 512  ;;  %p686_p0 = scmp.lt.s32.totalorder %s920_s7, %s684_s6 }
  0x2d   : > { %p681_p1 = pnand %p679_p9, %p929_p2  ;;  %p687_p12 = scmp.lt.s32.totalorder %s685_s11, %s678_s29 }
  0x2f   : > { %p682_p3 = pneg %p681_p1  ;;  %p688_p11 = por %p687_p12, %p686_p0 }
  0x31   : > { %p689_p6 = pnand %p688_p11, %p682_p3 }
  0x33   : > { %692 = shalt.err (!%p689_p6)
}
  0x34   : > { %s1135_s9 = smov 128   ;;  %s1137_s17 = smov 8  }
  0x35   : > { %618 = dma.hbm_to_vmem [thread:$0]  (!%p908_p13), %s917_s5, 256, %s920_s7, %s923_s8, %s1135_s9, %s1135_s9, %s1137_s17  }
  0x36   : > { %p205_p9 = scmp.lt.s32.totalorder %s817_s15, 3  ;;  %s1147_s0 = sld [smem:[#allocation12_spill]] }
  0x37   : > { %p1148_p6 = scmp.ge.s32.totalorder %s817_s15, 1  ;;  %s148_s4 = scalar_lea.vmem [#allocation2], %s906_s27 }
  0x38   : > { %s155_s6 = sshll.u32 %s148_s4, 4  ;;  %s145_s5 = scalar_lea.sflag [#allocation3], %s144_s25  ;;  %s969_s6 = int_to_ptr.vmem [resolvable:$true] %s155_s6 }
  0x39   : > { %p964_p11 = pnand %p1148_p6, %p205_p9 }
  0x3b   : > { %s1149_s29 = scalar_select %p964_p11, 1, 0 }
  0x3c   : > { %s960_s30 = scalar_lea.hbm %s1147_s0, %s902_s26  ;;  %s698_s20 = scalar_lea.hbm %s1147_s0, 512 }
  0x3d   : > { %s693_s7 = scalar_lea.hbm %s960_s30, 256  ;;  %p699_p5 = scmp.lt.s32.totalorder %s960_s30, %s1147_s0 }
  0x3e   : > { %p694_p12 = scmp.ne.s32.totalorder %s960_s30, %s693_s7  ;;  %p700_p7 = scmp.lt.s32.totalorder %s698_s20, %s693_s7 }
  0x40   : > { %p696_p0 = pnand %p694_p12, %p929_p2  ;;  %p701_p8 = por %p700_p7, %p699_p5 }
  0x42   : > { %p697_p4 = pneg %p696_p0 }
  0x44   : > { %p702_p10 = pnand %p701_p8, %p697_p4 }
  0x46   : > { %705 = shalt.err (!%p702_p10)
}
  0x47   : > { %s706_s25 = scalar_lea.vmem %s969_s6, 256  ;;  %s822_s4 = smov [#allocation2]  }
  0x48   : > { %p707_p1 = scmp.ne.s32.totalorder %s969_s6, %s706_s25  ;;  %s711_s11 = sshll.u32 %s822_s4, 4  ;;  %s712_s11 = int_to_ptr.vmem [resolvable:$false] %s711_s11 }
  0x49   : > { %s713_s19 = scalar_lea.vmem %s712_s11, 512  ;;  %p714_p6 = scmp.lt.s32.totalorder %s969_s6, %s712_s11 }
  0x4a   : > { %p709_p3 = pnand %p707_p1, %p929_p2  ;;  %p715_p12 = scmp.lt.s32.totalorder %s713_s19, %s706_s25 }
  0x4c   : > { %p710_p9 = pneg %p709_p3  ;;  %p716_p0 = por %p715_p12, %p714_p6 }
  0x4e   : > { %p717_p11 = pnand %p716_p0, %p710_p9 }
  0x50   : > { %720 = shalt.err (!%p717_p11)
}
  0x51   : > { %s1150_s9 = smov 8   ;;  %s1151_s17 = smov 128  }
  0x52   : > { %615 = dma.hbm_to_vmem [thread:$0]  (!%p908_p13), %s960_s30, 256, %s969_s6, %s145_s5, %s1151_s17, %s1151_s17, %s1150_s9  }
  0x53   : > { %s1000_s4 = scalar_lea.hbm %s1131_s2, %s902_s26  ;;  %s190_s25 = scalar_lea.vmem [#allocation7], %s906_s27 }
  0x54   : > { %s197_s11 = sshll.u32 %s190_s25, 4  ;;  %s721_s19 = scalar_lea.hbm %s1000_s4, 256  ;;  %s198_s11 = int_to_ptr.vmem [resolvable:$true] %s197_s11 }
  0x55   : > { %p722_p11 = scmp.ne.s32.totalorder %s1000_s4, %s721_s19  ;;  %s726_s30 = scalar_lea.hbm %s1131_s2, 512 }
  0x56   : > { %p727_p7 = scmp.lt.s32.totalorder %s1000_s4, %s1131_s2  ;;  %p728_p8 = scmp.lt.s32.totalorder %s726_s30, %s721_s19 }
  0x57   : > { %p724_p4 = pnand %p722_p11, %p929_p2 }
  0x58   : > { %p729_p10 = por %p728_p8, %p727_p7 }
  0x59   : > { %p725_p5 = pneg %p724_p4 }
  0x5b   : > { %p730_p1 = pnand %p729_p10, %p725_p5 }
  0x5d   : > { %733 = shalt.err (!%p730_p1)
}
  0x5e   : > { %s734_s26 = scalar_lea.vmem %s198_s11, 256  ;;  %s823_s27 = smov [#allocation7]  }
  0x5f   : > { %p735_p3 = scmp.ne.s32.totalorder %s198_s11, %s734_s26  ;;  %s739_s7 = sshll.u32 %s823_s27, 4  ;;  %s740_s7 = int_to_ptr.vmem [resolvable:$false] %s739_s7 }
  0x60   : > { %s741_s20 = scalar_lea.vmem %s740_s7, 512  ;;  %p742_p12 = scmp.lt.s32.totalorder %s198_s11, %s740_s7 }
  0x61   : > { %p737_p9 = pnand %p735_p3, %p929_p2  ;;  %p743_p0 = scmp.lt.s32.totalorder %s741_s20, %s734_s26 }
  0x63   : > { %p738_p6 = pneg %p737_p9  ;;  %p744_p11 = por %p743_p0, %p742_p12 }
  0x65   : > { %p745_p4 = pnand %p744_p11, %p738_p6 }
  0x67   : > { %748 = shalt.err (!%p745_p4)
}
  0x68   : > { %621 = dma.hbm_to_vmem [thread:$0]  (!%p908_p13), %s1000_s4, 256, %s198_s11, %s923_s8, %s1151_s17, %s1151_s17, %s1150_s9  }
  0x69   : > { %p1152_p2 = scmp.ne.s32.totalorder %s1149_s29, 0 }
  0x6a   : > { %s1026_s0 = sand.u32 (!%p1152_p2), 1, %s809_s13   ;;  %p1153_p5 = scmp.ne.s32.totalorder (!%p1152_p2), %s1141_s22, 0 }
  0x6b   : > { %209 = sbr.rel (%p1152_p2) target bundleno = 762 (0x2fa), region = 32  ;;  %s579_s1 = sshll.u32 (!%p1152_p2), %s1026_s0, 4 }
  0x6c   : > { %s212_s10 = scalar_lea.sflag (!%p1152_p2), [#allocation3], %s1026_s0  ;;  %s215_s25 = scalar_lea.vmem (!%p1152_p2), [#allocation2], %s579_s1 }
  0x70   : > { %792 = dma.done.wait (%p1153_p5), %s212_s10, 256  }
  0x71   : > { %794 = vsyncadd (%p1153_p5), %s212_s10, 4294967040  ;;  %s220_s28 = sand.u32 1, %s867_s16   ;;  %s224_s29 = scalar_lea.vmem [#allocation5], %s579_s1 }
  0x72   : > { %s221_s8 = scalar_lea.sflag [#allocation6], %s220_s28 }
  0x73   : > { %796 = dma.done.wait (%p1153_p5), %s221_s8, 512  }
  0x74   : > { %798 = vsyncadd (%p1153_p5), %s221_s8, 4294966784  ;;  %s233_s9 = scalar_lea.vmem [#allocation7], %s579_s1  ;;  %v1043_v2 = vld [vmem:[%s215_s25] sm:$0xff]  ;;  %v1047_v4 = vld [vmem:[%s215_s25 + $0x8] sm:$0xff]  ;;  %p1154_p8 = scmp.ne.s32.totalorder %s1142_s23, 0 }
  0x75   : > { %v1039_v0 = vld [vmem:[%s233_s9] sm:$0xff]  ;;  %v1041_v1 = vld [vmem:[%s233_s9 + $0x8] sm:$0xff] }
  0x76   : > { %v299_v3 = vadd.f32 %v1041_v1, %v1039_v0  ;;  %v275_v5 = vmul.f32 %v1039_v0, %v1043_v2  ;;  %v267_v6 = vld [vmem:[%s224_s29] sm:$0xff]  ;;  %v268_v7 = vld [vmem:[%s224_s29 + $0x8] sm:$0xff]  ;;  %v276_v8 = vmul.f32 %v1041_v1, %v1047_v4 }
  0x77   : > { %v269_v9 = vmul.f32 50.0, %v267_v6  ;;  %v270_v10 = vmul.f32 50.0, %v268_v7 }
  0x78   : > { %300 = vadd.xlane.f32.xlu1 %v299_v3  ;;  %v277_v11 = vmul.f32 %v275_v5, %v1043_v2  ;;  %v278_v12 = vmul.f32 %v276_v8, %v1047_v4  ;;  %v289_v19 = vadd.f32 %v276_v8, %v275_v5 }
  0x79   : > { %v1055_v13 = vadd.f32 0.5, %v269_v9  ;;  %v1057_v14 = vadd.f32 0.5, %v270_v10 }
  0x7a   : > { %v279_v15 = vadd.f32 %v278_v12, %v277_v11 }
  0x7b   : > { %v309_v16 = vmul.f32 %v275_v5, %v1055_v13  ;;  %v310_v17 = vmul.f32 %v276_v8, %v1057_v14  ;;  %v321_v20 = vmul.f32 %v1039_v0, %v1055_v13  ;;  %v322_v21 = vmul.f32 %v1041_v1, %v1057_v14 }
  0x7c   : > { %280 = vadd.xlane.f32.xlu0 %v279_v15 }
  0x7d   : > { %v311_v18 = vadd.f32 %v310_v17, %v309_v16  ;;  %v323_v22 = vadd.f32 %v322_v21, %v321_v20  ;;  %v393_v16 = vrot.slane %v1041_v1, 1 }
  0x7f   : > { %312 = vadd.xlane.f32.xlu1 %v311_v18 }
  0x80   : > { %290 = vadd.xlane.f32.xlu0 %v289_v19 }
  0x84   : > { %324 = vadd.xlane.f32.xlu0 %v323_v22 }
 0x101   : > { %v301_v23 = vpop.xlane.xlu1 %300 }
 0x102   : > { %v302_v24 = vrot.slane %v301_v23, 4 }
 0x104   : > { %v303_v25 = vadd.f32 %v302_v24, %v301_v23 }
 0x105   : > { %v281_v26 = vpop.xlane.xlu0 %280 }
 0x106   : > { %v282_v27 = vrot.slane %v281_v26, 4  ;;  %v304_v31 = vrot.slane %v303_v25, 2 }
 0x108   : > { %v313_v28 = vpop.xlane.xlu1 %312  ;;  %v283_v29 = vadd.f32 %v282_v27, %v281_v26  ;;  %v305_v40 = vadd.f32 %v304_v31, %v303_v25 }
 0x109   : > { %v314_v30 = vrot.slane %v313_v28, 4  ;;  %v291_v32 = vpop.xlane.xlu0 %290 }
 0x10a   : > { %v284_v33 = vrot.slane %v283_v29, 2  ;;  %v292_v35 = vrot.slane %v291_v32, 4  ;;  %v306_v49 = vrot.slane %v305_v40, 1 }
 0x10b   : > { %v315_v34 = vadd.f32 %v314_v30, %v313_v28 }
 0x10c   : > { %v293_v37 = vadd.f32 %v292_v35, %v291_v32  ;;  %v285_v38 = vadd.f32 %v284_v33, %v283_v29  ;;  %v307_v55 = vadd.f32 %v306_v49, %v305_v40 }
 0x10d   : > { %v316_v36 = vrot.slane %v315_v34, 2  ;;  %v325_v39 = vpop.xlane.xlu0 %324 }
 0x10e   : > { %v294_v41 = vrot.slane %v293_v37, 2  ;;  %v326_v42 = vrot.slane %v325_v39, 4  ;;  %v286_v43 = vrot.slane %v285_v38, 1 }
 0x10f   : > { %v317_v44 = vadd.f32 %v316_v36, %v315_v34 }
 0x110   : > { %v327_v45 = vadd.f32 %v326_v42, %v325_v39  ;;  %v287_v46 = vadd.f32 %v286_v43, %v285_v38  ;;  %v295_v47 = vadd.f32 %v294_v41, %v293_v37 }
 0x111   : > { %v318_v48 = vrot.slane %v317_v44, 1 }
 0x112   : > { %v328_v50 = vrot.slane %v327_v45, 2  ;;  %588 = vpush %v287_v46  ;;  %v296_v51 = vrot.slane %v295_v47, 1 }
 0x113   : > { %v319_v53 = vadd.f32 %v318_v48, %v317_v44 }
 0x114   : > { %v297_v52 = vadd.f32 %v296_v51, %v295_v47  ;;  %v329_v54 = vadd.f32 %v328_v50, %v327_v45 }
 0x116   : > { %590 = vpush %v297_v52  ;;  %v330_v56 = vrot.slane %v329_v54, 1 }
 0x117   : > { %592 = vpush %v307_v55 }
 0x118   : > { %594 = vpush %v319_v53  ;;  %v331_v57 = vadd.f32 %v330_v56, %v329_v54 }
 0x11a   : > { %596 = vpush %v331_v57 }
 0x143   : > { %s589_s22 = spop %588 }
 0x147   : > { %s591_s17 = spop %590 }
 0x148   : > { %s334_s4 = smul.f32 %s591_s17, %s591_s17  ;;  %s1065_s11 = spop %592 }
 0x149   : > { %s333_s19 = smul.f32 %s1065_s11, %s589_s22  ;;  %s595_s30 = spop %594 }
 0x14a   : > { %s346_s6 = ssub.f32 0.0, %s591_s17  ;;  %s338_s27 = smul.f32 %s595_s30, %s1065_s11 }
 0x14b   : > { %s597_s5 = spop %596  ;;  %s335_s26 = ssub.f32 %s333_s19, %s334_s4 }
 0x14c   : > { %s339_s7 = smul.f32 %s597_s5, %s591_s17  ;;  %s582_s17 = sshll.u32 %s867_s16, 4 }
 0x14d   : > { %p336_p13 = scmp.ne.f32.partialorder %s335_s26, 0.0  ;;  %s348_s20 = smul.f32 %s597_s5, %s589_s22 }
 0x14e   : > { %s347_s1 = smul.f32 %s595_s30, %s346_s6  ;;  %s340_s10 = ssub.f32 %s338_s27, %s339_s7 }
 0x14f   : > { %s337_s25 = scalar_select %p336_p13, %s335_s26, 1.0 }
 0x150   : > { %s349_s28 = sadd.f32 %s348_s20, %s347_s1  ;;  %s824_s22 = smov 127  }
 0x151   : > { %v341_v58 = vstv %s337_s25  ;;  %s264_s19 = scalar_lea.vmem [#allocation8], %s1026_s0  ;;  %s1092_s27 = scalar_lea.hbm %s1132_s3, %s582_s17 }
 0x152   : > { %663 = vrcp.f32 %v341_v58  ;;  %s457_s30 = sshll.u32 %s264_s19, 4  ;;  %s445_s16 = scalar_lea.sflag [#allocation4], %s1026_s0  ;;  %s458_s30 = int_to_ptr.vmem [resolvable:$true] %s457_s30 }
 0x153   : > { %s825_s7 = smov [#allocation8]  }
 0x154   : > { %s753_s20 = sshll.u32 %s825_s7, 4  ;;  %s754_s20 = int_to_ptr.vmem [resolvable:$false] %s753_s20 }
 0x155   : > { %s755_s1 = scalar_lea.vmem %s754_s20, 32  ;;  %p756_p3 = scmp.lt.s32.totalorder %s458_s30, %s754_s20 }
 0x15f   : > { %v664_v59 = vpop.eup %663 }
 0x160   : > { %598 = vpush %v664_v59 }
 0x191   : > { %s599_s8 = spop %598 }
 0x192   : > { %s344_s29 = smul.f32 %s599_s8, %s340_s10 }
 0x193   : > { %s353_s9 = smul.f32 %s599_s8, %s349_s28 }
 0x194   : > { %s1162_s29 = smov (!%p336_p13, %s344_s29), 0.0 }
 0x195   : > { %s1164_s9 = smov (!%p336_p13, %s353_s9), 0.0  ;;  %v355_v60 = vstv %s1162_s29 }
 0x196   : > { %v356_v61 = vmul.f32 %v355_v60, %v1043_v2  ;;  %v357_v62 = vmul.f32 %v355_v60, %v1047_v4  ;;  %v358_v63 = vstv %s1164_s9  ;;  %v387_v2 = vlaneseq }
 0x198   : > { %v359_v3 = vadd.f32 %v358_v63, %v356_v61  ;;  %v360_v5 = vadd.f32 %v358_v63, %v357_v62  ;;  %v388_v4 = vshrl.u32 %v387_v2, 7  ;;  %v397_v32 = vand.u32 127, %v387_v2 }
 0x199   : > { %v437_v61 = vstv %s1065_s11  ;;  %s749_s11 = scalar_lea.vmem %s458_s30, 16 }
 0x19a   : > { %v361_v6 = vsub.f32 %v359_v3, %v1055_v13  ;;  %v362_v7 = vsub.f32 %v360_v5, %v1057_v14  ;;  %vm389_vm0 = vcmp.lt.s32.totalorder %v388_v4, 7  ;;  %v392_v14 = vrot.slane %v1039_v0, 1  ;;  %p750_p7 = scmp.ne.s32.totalorder %s458_s30, %s749_s11  ;;  %p757_p9 = scmp.lt.s32.totalorder %s755_s1, %s749_s11 }
 0x19b   : > { %v398_v33 = vadd.s32 8, %v388_v4  ;;  %vm399_vm1 = vcmp.lt.s32.totalorder %v397_v32, 15  ;;  %vm436_vm3 = vcmp.eq.s32.totalorder %v397_v32, 2  ;;  %vm435_vm4 = vcmp.eq.s32.totalorder %v397_v32, 1 }
 0x19c   : > { %v363_v8 = vmul.f32 %v361_v6, %v1039_v0  ;;  %v364_v9 = vmul.f32 %v362_v7, %v1041_v1  ;;  %v395_v21 = vsel %vm389_vm0, %v393_v16, %v392_v14  ;;  %v394_v25 = vsel %vm389_vm0, %v392_v14, %v393_v16  ;;  %p751_p10 = pnand %p750_p7, %p1154_p8  ;;  %p758_p6 = por %p757_p9, %p756_p3 }
 0x19d   : > { %v417_v27 = vmul.f32 %v395_v21, %v1041_v1  ;;  %v416_v37 = vmul.f32 %v394_v25, %v1039_v0  ;;  %vm411_vm2 = vcmp.lt.s32.totalorder %v398_v33, 15  ;;  %vm434_vm5 = vcmp.eq.s32.totalorder %v397_v32, 0 }
 0x19e   : > { %379 = vrot.lane.b32.xlu0 %v364_v9, %s824_s22  ;;  %377 = vrot.lane.b32.xlu1 %v363_v8, %s824_s22  ;;  %v365_v10 = vmul.f32 %v363_v8, %v361_v6  ;;  %v366_v11 = vmul.f32 %v364_v9, %v362_v7  ;;  %v385_v13 = vrot.slane %v363_v8, 1  ;;  %v386_v15 = vrot.slane %v364_v9, 1  ;;  %p752_p1 = pneg %p751_p10 }
 0x19f   : > { %v438_v62 = vsel %vm436_vm3, %v437_v61, 0.0 }
 0x1a0   : > { %v367_v12 = vadd.f32 %v366_v11, %v365_v10  ;;  %v391_v17 = vsel %vm389_vm0, %v386_v15, %v385_v13  ;;  %v390_v20 = vsel %vm389_vm0, %v385_v13, %v386_v15  ;;  %p759_p12 = pnand %p758_p6, %p752_p1 }
 0x1a1   : > { %v413_v22 = vsub.f32 %v391_v17, %v364_v9  ;;  %v412_v26 = vsub.f32 %v390_v20, %v363_v8 }
 0x1a2   : > { %381 = vrot.lane.b32.xlu1 %v1039_v0, %s824_s22 }
 0x1a3   : > { %v415_v31 = vand.u32 2147483647, %v413_v22  ;;  %v414_v36 = vand.u32 2147483647, %v412_v26 }
 0x1a5   : > { %v419_v40 = vmul.f32 %v417_v27, %v415_v31  ;;  %v418_v43 = vmul.f32 %v416_v37, %v414_v36 }
 0x1a6   : > { %383 = vrot.lane.b32.xlu1 %v1041_v1, %s824_s22 }
 0x1a7   : > { %v421_v45 = vsel %vm411_vm2, %v419_v40, 0.0 }
 0x1ca   : > { %368 = vadd.xlane.f32.xlu1 %v367_v12 }
 0x210   : > { %v378_v18 = vpop.permute.xlu1 %377  ;;  %v380_v23 = vpop.permute.xlu0 %379 }
 0x211   : > { %v400_v19 = vsub.f32 %v378_v18, %v363_v8  ;;  %v401_v28 = vsub.f32 %v380_v23, %v364_v9 }
 0x213   : > { %v402_v29 = vand.u32 2147483647, %v400_v19  ;;  %v403_v38 = vand.u32 2147483647, %v401_v28 }
 0x214   : > { %v382_v24 = vpop.permute.xlu1 %381 }
 0x215   : > { %v404_v30 = vmul.f32 %v382_v24, %v1039_v0 }
 0x217   : > { %v406_v34 = vmul.f32 %v404_v30, %v402_v29 }
 0x218   : > { %v384_v35 = vpop.permute.xlu1 %383 }
 0x219   : > { %v405_v39 = vmul.f32 %v384_v35, %v1041_v1  ;;  %v408_v42 = vsel %vm399_vm1, %v406_v34, 0.0 }
 0x21a   : > { %v422_v46 = vadd.f32 %v418_v43, %v408_v42 }
 0x21b   : > { %v407_v41 = vmul.f32 %v405_v39, %v403_v38 }
 0x21d   : > { %v409_v44 = vsel %vm399_vm1, %v407_v41, 0.0 }
 0x21e   : > { %v423_v47 = vadd.f32 %v421_v45, %v409_v44 }
 0x220   : > { %v424_v48 = vadd.f32 %v423_v47, %v422_v46 }
 0x222   : > { %425 = vadd.xlane.f32.xlu0 %v424_v48 }
 0x253   : > { %v369_v49 = vpop.xlane.xlu1 %368 }
 0x254   : > { %v370_v50 = vrot.slane %v369_v49, 4 }
 0x256   : > { %v371_v51 = vadd.f32 %v370_v50, %v369_v49 }
 0x258   : > { %v372_v0 = vrot.slane %v371_v51, 2 }
 0x25a   : > { %v373_v52 = vadd.f32 %v372_v0, %v371_v51 }
 0x25c   : > { %v374_v53 = vrot.slane %v373_v52, 1 }
 0x25e   : > { %v375_v1 = vadd.f32 %v374_v53, %v373_v52 }
 0x260   : > { %600 = vpush %v375_v1 }
 0x291   : > { %s601_s4 = spop %600 }
 0x292   : > { %v441_v3 = vstv %s601_s4 }
 0x2ab   : > { %v426_v54 = vpop.xlane.xlu0 %425 }
 0x2ac   : > { %v427_v55 = vrot.slane %v426_v54, 4 }
 0x2ae   : > { %v428_v56 = vadd.f32 %v427_v55, %v426_v54 }
 0x2b0   : > { %v429_v57 = vrot.slane %v428_v56, 2 }
 0x2b2   : > { %v430_v58 = vadd.f32 %v429_v57, %v428_v56 }
 0x2b4   : > { %v431_v59 = vrot.slane %v430_v58, 1 }
 0x2b6   : > { %v432_v60 = vadd.f32 %v431_v59, %v430_v58 }
 0x2b8   : > { %602 = vpush %v432_v60 }
 0x2e9   : > { %s603_s6 = spop %602 }
 0x2ea   : > { %v439_v63 = vstv %s603_s6 }
 0x2eb   : > { %v440_v5 = vsel %vm435_vm4, %v439_v63, %v438_v62 }
 0x2ec   : > { %v442_v6 = vsel %vm434_vm5, %v441_v3, %v440_v5 }
 0x2ed   : > { %443 = vst [vmem:[%s264_s19] sm:$0x1] %v442_v6 }
 0x2ee   : > { %762 = shalt.err (!%p759_p12)
}
 0x2ef   : > { %s763_s10 = scalar_lea.hbm %s1092_s27, 16  ;;  %s767_s28 = scalar_lea.hbm %s1132_s3, 32 }
 0x2f0   : > { %p764_p0 = scmp.ne.s32.totalorder %s1092_s27, %s763_s10  ;;  %p768_p2 = scmp.lt.s32.totalorder %s1092_s27, %s1132_s3 }
 0x2f1   : > { %p769_p5 = scmp.lt.s32.totalorder %s767_s28, %s763_s10 }
 0x2f2   : > { %p765_p11 = pnand %p764_p0, %p1154_p8 }
 0x2f3   : > { %p770_p13 = por %p769_p5, %p768_p2 }
 0x2f4   : > { %p766_p4 = pneg %p765_p11 }
 0x2f6   : > { %p771_p7 = pnand %p770_p13, %p766_p4 }
 0x2f8   : > { %774 = shalt.err (!%p771_p7)
}
 0x2f9   : > { %610 = dma.vmem_to_hbm [thread:$0]  (%p1154_p8), %s458_s30, 16, %s1092_s27, %s445_s16  }
 0x2fa PF: > { %s469_s9 = sand.u32 1, %s805_s12   ;;  %p1155_p10 = scmp.ne.s32.totalorder %s1143_s24, 0 }
 0x2fb   : > { %p1156_p1 = scmp.ge.s32.totalorder %s817_s15, 2  ;;  %s470_s22 = scalar_lea.sflag [#allocation4], %s469_s9 }
 0x2fd   : > { %p623_p3 = pnand %p1156_p1, %p1155_p10 }
 0x2ff   : > { %p624_p9 = pneg %p623_p3 }
 0x301   : > { %800 = dma.done.wait (%p624_p9), %s470_s22, 16  }
 0x302   : > { %802 = vsyncadd (%p624_p9), %s470_s22, 4294967280  ;;  %p19_p6 = scmp.ge.s32.totalorder %s871_s18, 4   ;;  %s1157_s12 = smov %s809_s13 }
 0x303   : > { %s1158_s13 = smov %s813_s14  ;;  %s1159_s14 = smov %s883_s21 }
 0x304   : > { %s1160_s15 = smov %s871_s18  ;;  %21 = sbr.rel (!%p19_p6) target bundleno = 10 (0xa), region = 101 }
 0x309   :  { %474 = vsyncpa [#allocation3], 1 }
 0x30a   :  { %476 = vsyncpa [#allocation3 + $0x1], 1 }
 0x30b   :  { %477 = vsyncpa [#allocation6], 1 }
 0x30c   :  { %479 = vsyncpa [#allocation6 + $0x1], 1 }
 0x30d   :  { %480 = vsyncpa [#allocation4], 1 }
 0x30e   :  { %482 = vsyncpa [#allocation4 + $0x1], 1 }

</bundles_post_ra>
